<compile_context>
chip_gen: v7x
topology: tpu7x:2x2x1
jax: 0.10.0
libtpu: 0.0.40
codegen_flags: <defaults>
</compile_context>

<pallas_src>
import functools
import math

import jax
import jax.numpy as jnp
from jax import lax
from jax.experimental import pallas as pl
from jax.experimental.pallas import tpu as pltpu

EPS = 1e-8


def _sss_kernel(w_ref, fp_ref, ft_ref, o_ref):
    """One (batch, frame-tile) step of the SSS loss.

    w_ref  : (2*nbp, n_fft) bf16   windowed DFT basis, [real; imag], zero-padded bins
    fp_ref : (n_fft, TM)    bf16   pred frames (time on sublanes, frames on lanes)
    ft_ref : (n_fft, TM)    bf16   true frames
    o_ref  : (1, 1, 128)    f32    partial sums: lane0 = sum|dS|, lane1 = sum|dlogS|
    """
    nbp = w_ref.shape[0] // 2

    w = w_ref[...]

    # Fused windowed DFT (real & imag stacked) -> one MXU matmul per signal.
    rp = jnp.dot(w, fp_ref[...], preferred_element_type=jnp.float32)   # (2*nbp, TM)
    rt = jnp.dot(w, ft_ref[...], preferred_element_type=jnp.float32)

    pr, pi = rp[:nbp, :], rp[nbp:, :]
    tr, ti = rt[:nbp, :], rt[nbp:, :]

    # Magnitude spectrograms (power=1), kept in f32 (log2(S+eps) is very
    # sensitive to bf16 rounding for near-zero bins).
    s_pred = jnp.sqrt(pr * pr + pi * pi)
    s_true = jnp.sqrt(tr * tr + ti * ti)

    # Padded frames/bins are exactly zero for both signals -> contribute 0 to
    # both sums (log2(eps) - log2(eps) == 0), so full-tile sums are safe.
    lin_sum = jnp.sum(jnp.abs(s_pred - s_true))
    log_sum = jnp.sum(jnp.abs(jnp.log2(s_true + EPS) - jnp.log2(s_pred + EPS)))

    lane = lax.broadcasted_iota(jnp.int32, (1, 128), 1)
    row = jnp.where(lane == 0, lin_sum, 0.0) + jnp.where(lane == 1, log_sum, 0.0)
    o_ref[...] = row.reshape(1, 1, 128)


def _make_packed_basis(n_fft: int):
    """Periodic hann window folded into a stacked [real; imag] onesided DFT basis.

    Returns (basis_bf16 of shape (2*nbp, n_fft), n_bins, nbp) where nbp is
    n_bins rounded up to a multiple of 8 (padded rows are zero).
    """
    n_bins = n_fft // 2 + 1
    nbp = ((n_bins + 7) // 8) * 8

    n = jnp.arange(n_fft, dtype=jnp.int32)
    # torch.hann_window (periodic)
    window = 0.5 - 0.5 * jnp.cos((2.0 * math.pi / n_fft) * n.astype(jnp.float32))

    k = jnp.arange(nbp, dtype=jnp.int32)
    # Reduce (k*n) mod n_fft exactly in integers BEFORE scaling to radians so
    # f32 cos/sin argument-reduction error does not grow with n_fft.
    kn = (k[:, None] * n[None, :]) % n_fft
    phase = (2.0 * math.pi / n_fft) * kn.astype(jnp.float32)      # (nbp, n_fft)
    valid = (k < n_bins)[:, None]

    wr = jnp.where(valid, jnp.cos(phase) * window[None, :], 0.0)
    wi = jnp.where(valid, -jnp.sin(phase) * window[None, :], 0.0)
    basis = jnp.concatenate([wr, wi], axis=0)                     # (2*nbp, n_fft)
    return basis.astype(jnp.bfloat16), n_bins, nbp


def _frame_signal(x: jnp.ndarray, n_fft: int, hop: int, n_frames_pad: int) -> jnp.ndarray:
    """center=True reflect pad + overlapping frames -> (B, n_fft, n_frames_pad) bf16.

    Cast to bf16 happens BEFORE the pad/gather so the XLA framing glue moves
    half the bytes; padding to the tile multiple stays in bf16.
    """
    pad = n_fft // 2
    xp = jnp.pad(x.astype(jnp.bfloat16), ((0, 0), (pad, pad)), mode="reflect")
    t_pad = xp.shape[-1]
    n_frames = 1 + (t_pad - n_fft) // hop
    idx = jnp.arange(n_fft)[:, None] + jnp.arange(n_frames)[None, :] * hop   # (n_fft, n_frames)
    frames = xp[:, idx]                                   # (B, n_fft, n_frames) bf16
    if n_frames_pad > n_frames:
        frames = jnp.pad(frames, ((0, 0), (0, 0), (0, n_frames_pad - n_frames)))
    return frames


def _pick_tm(n_fft: int, nbp: int, n_frames: int, batch: int):
    """Generation-aware frame-tile size (multiple of 128 lanes)."""
    m128 = ((n_frames + 127) // 128) * 128
    try:
        vmem_cap = int(pltpu.get_tpu_info().vmem_capacity_bytes)
    except Exception:
        vmem_cap = 64 * 1024 * 1024          # conservative fallback (v7x-sized)

    # Per frame-column: 2 signals x 2 pipeline buffers x n_fft bf16 samples
    # plus ~6 live f32 intermediates of height 2*nbp.
    per_col = 2 * 2 * n_fft * 2 + 6 * 2 * nbp * 4
    tm = int(vmem_cap * 0.65) // max(per_col, 1)
    tm = (tm // 128) * 128
    tm = max(128, min(8192, tm, m128))

    # Megacore (v7x has 2 TensorCores): keep >= 2 grid points when possible.
    if batch == 1 and tm >= m128 and m128 >= 256:
        tm = ((m128 // 2 + 127) // 128) * 128
    return tm, vmem_cap


def sss_loss(pred: jnp.ndarray, target: jnp.ndarray, *, n_fft: int = 64,
             hop_length: int | None = None, alpha: float = 1.0) -> jnp.ndarray:
    """SSSLoss forward.  pred, target: (B, T) float32 audio."""
    if hop_length is None:
        hop_length = n_fft // 2                               # torchaudio default

    B, T = pred.shape
    basis, n_bins, nbp = _make_packed_basis(n_fft)

    t_pad = T + 2 * (n_fft // 2)
    n_frames = 1 + (t_pad - n_fft) // hop_length

    TM, vmem_cap = _pick_tm(n_fft, nbp, n_frames, B)
    n_frames_pad = ((n_frames + TM - 1) // TM) * TM
    num_tiles = n_frames_pad // TM

    fp = _frame_signal(pred, n_fft, hop_length, n_frames_pad)    # (B, n_fft, n_frames_pad)
    ft = _frame_signal(target, n_fft, hop_length, n_frames_pad)

    partials = pl.pallas_call(
        _sss_kernel,
        out_shape=jax.ShapeDtypeStruct((B, num_tiles, 1, 128), jnp.float32),
        grid_spec=pltpu.PrefetchScalarGridSpec(
            num_scalar_prefetch=0,
            grid=(B, num_tiles),
            in_specs=[
                pl.BlockSpec((2 * nbp, n_fft), lambda b, i: (0, 0)),      # basis (resident)
                pl.BlockSpec((None, n_fft, TM), lambda b, i: (b, 0, i)),  # pred frame tile
                pl.BlockSpec((None, n_fft, TM), lambda b, i: (b, 0, i)),  # true frame tile
            ],
            out_specs=pl.BlockSpec((None, 1, 1, 128), lambda b, i: (b, i, 0, 0)),
        ),
        compiler_params=pltpu.CompilerParams(
            dimension_semantics=("parallel", "parallel"),   # both axes independent -> megacore
            vmem_limit_bytes=min(int(vmem_cap * 0.85), 100 * 1024 * 1024),
        ),
    )(basis, fp, ft)

    # Final tiny reduce + mean normalization by the TRUE element count (not padded).
    count = jnp.float32(B * n_frames * n_bins)
    lin_total = jnp.sum(partials[:, :, 0, 0])
    log_total = jnp.sum(partials[:, :, 0, 1])
    return lin_total / count + jnp.float32(alpha) * (log_total / count)


if __name__ == "__main__":
    key = jax.random.PRNGKey(0)
    k1, k2 = jax.random.split(key)

    # Small audio: batch=2, 256 samples; n_fft=64, hop=32 -> 9 frames, 33 bins.
    B, T = 2, 256
    pred = jax.random.normal(k1, (B, T), dtype=jnp.float32)
    target = jax.random.normal(k2, (B, T), dtype=jnp.float32)

    loss_fn = jax.jit(functools.partial(sss_loss, n_fft=64, alpha=1.0))
    loss = loss_fn(pred, target)
    loss = jax.block_until_ready(loss)
    assert jnp.isfinite(loss), "loss is not finite"
    print("KERNEL_OK")
</pallas_src>

<mosaic_0001>
module attributes {stable_mosaic.version = 11 : i64} {
  func.func @_sss_kernel(%arg0: i32, %arg1: i32, %arg2: memref<80x64xbf16, #tpu.memory_space<vmem>>, %arg3: memref<1x64x128xbf16, #tpu.memory_space<vmem>>, %arg4: memref<1x64x128xbf16, #tpu.memory_space<vmem>>, %arg5: memref<1x1x1x128xf32, #tpu.memory_space<vmem>>) attributes {dimension_semantics = [#tpu.dimension_semantics<parallel>, #tpu.dimension_semantics<parallel>], iteration_bounds = array<i64: 2, 1>, scalar_prefetch = 0 : i64, scratch_operands = 0 : i64, tpu.core_type = #tpu.core_type<tc>, window_params = [{pipeline_mode = #tpu.pipeline_mode<synchronous>, transform_indices = @transform_0, window_bounds = array<i64: 80, 64>}, {transform_indices = @transform_1, window_bounds = array<i64: 1, 64, 128>}, {transform_indices = @transform_2, window_bounds = array<i64: 1, 64, 128>}, {transform_indices = @transform_3, window_bounds = array<i64: 1, 1, 1, 128>}]} {
    %c0 = arith.constant 0 : index
    %c0_0 = arith.constant 0 : index
    %0 = vector.load %arg2[%c0, %c0_0] : memref<80x64xbf16, #tpu.memory_space<vmem>>, vector<80x64xbf16>
    %c0_1 = arith.constant 0 : index
    %c0_2 = arith.constant 0 : index
    %c0_3 = arith.constant 0 : index
    %1 = vector.load %arg3[%c0_1, %c0_2, %c0_3] : memref<1x64x128xbf16, #tpu.memory_space<vmem>>, vector<1x64x128xbf16>
    %2 = vector.shape_cast %1 : vector<1x64x128xbf16> to vector<64x128xbf16>
    %cst = arith.constant dense<0.000000e+00> : vector<80x128xf32>
    %3 = tpu.matmul %0, %2, %cst {dimension_numbers = #tpu.dot_dimension_numbers<[1], [0], [0], [1], [0, 0, 1, 1], [], []>} : vector<80x64xbf16>, vector<64x128xbf16>, vector<80x128xf32> -> vector<80x128xf32>
    %c0_4 = arith.constant 0 : index
    %c0_5 = arith.constant 0 : index
    %c0_6 = arith.constant 0 : index
    %4 = vector.load %arg4[%c0_4, %c0_5, %c0_6] : memref<1x64x128xbf16, #tpu.memory_space<vmem>>, vector<1x64x128xbf16>
    %5 = vector.shape_cast %4 : vector<1x64x128xbf16> to vector<64x128xbf16>
    %cst_7 = arith.constant dense<0.000000e+00> : vector<80x128xf32>
    %6 = tpu.matmul %0, %5, %cst_7 {dimension_numbers = #tpu.dot_dimension_numbers<[1], [0], [0], [1], [0, 0, 1, 1], [], []>} : vector<80x64xbf16>, vector<64x128xbf16>, vector<80x128xf32> -> vector<80x128xf32>
    %7 = vector.extract_strided_slice %3 {offsets = [0, 0], sizes = [40, 128], strides = [1, 1]} : vector<80x128xf32> to vector<40x128xf32>
    %8 = vector.extract_strided_slice %3 {offsets = [40, 0], sizes = [40, 128], strides = [1, 1]} : vector<80x128xf32> to vector<40x128xf32>
    %9 = vector.extract_strided_slice %6 {offsets = [0, 0], sizes = [40, 128], strides = [1, 1]} : vector<80x128xf32> to vector<40x128xf32>
    %10 = vector.extract_strided_slice %6 {offsets = [40, 0], sizes = [40, 128], strides = [1, 1]} : vector<80x128xf32> to vector<40x128xf32>
    %11 = arith.mulf %7, %7 : vector<40x128xf32>
    %12 = arith.mulf %8, %8 : vector<40x128xf32>
    %13 = arith.addf %11, %12 : vector<40x128xf32>
    %14 = math.sqrt %13 : vector<40x128xf32>
    %15 = arith.mulf %9, %9 : vector<40x128xf32>
    %16 = arith.mulf %10, %10 : vector<40x128xf32>
    %17 = arith.addf %15, %16 : vector<40x128xf32>
    %18 = math.sqrt %17 : vector<40x128xf32>
    %19 = arith.subf %14, %18 : vector<40x128xf32>
    %20 = math.absf %19 : vector<40x128xf32>
    %21 = vector.shape_cast %20 : vector<40x128xf32> to vector<1x40x128xf32>
    %cst_8 = arith.constant dense<0.000000e+00> : vector<1xf32>
    %22 = vector.multi_reduction <add>, %21, %cst_8 [1, 2] : vector<1x40x128xf32> to vector<1xf32>
    %23 = vector.shape_cast %22 : vector<1xf32> to vector<1x1x1xf32>
    %24 = vector.extract %23[0, 0, 0] : f32 from vector<1x1x1xf32>
    %cst_9 = arith.constant 9.99999993E-9 : f32
    %25 = vector.broadcast %cst_9 : f32 to vector<40x128xf32>
    %26 = arith.addf %18, %25 : vector<40x128xf32>
    %27 = math.log %26 : vector<40x128xf32>
    %cst_10 = arith.constant 2.000000e+00 : f32
    %28 = math.log %cst_10 : f32
    %29 = vector.broadcast %28 : f32 to vector<40x128xf32>
    %30 = arith.divf %27, %29 : vector<40x128xf32>
    %cst_11 = arith.constant 9.99999993E-9 : f32
    %31 = vector.broadcast %cst_11 : f32 to vector<40x128xf32>
    %32 = arith.addf %14, %31 : vector<40x128xf32>
    %33 = math.log %32 : vector<40x128xf32>
    %cst_12 = arith.constant 2.000000e+00 : f32
    %34 = math.log %cst_12 : f32
    %35 = vector.broadcast %34 : f32 to vector<40x128xf32>
    %36 = arith.divf %33, %35 : vector<40x128xf32>
    %37 = arith.subf %30, %36 : vector<40x128xf32>
    %38 = math.absf %37 : vector<40x128xf32>
    %39 = vector.shape_cast %38 : vector<40x128xf32> to vector<1x40x128xf32>
    %cst_13 = arith.constant dense<0.000000e+00> : vector<1xf32>
    %40 = vector.multi_reduction <add>, %39, %cst_13 [1, 2] : vector<1x40x128xf32> to vector<1xf32>
    %41 = vector.shape_cast %40 : vector<1xf32> to vector<1x1x1xf32>
    %42 = vector.extract %41[0, 0, 0] : f32 from vector<1x1x1xf32>
    %43 = tpu.iota {dimensions = array<i32: 1>} : vector<1x128xi32>
    %c0_i32 = arith.constant 0 : i32
    %44 = vector.broadcast %c0_i32 : i32 to vector<1x128xi32>
    %45 = arith.cmpi eq, %43, %44 : vector<1x128xi32>
    %cst_14 = arith.constant 0.000000e+00 : f32
    %46 = vector.broadcast %24 : f32 to vector<1x128xf32>
    %47 = vector.broadcast %cst_14 : f32 to vector<1x128xf32>
    %48 = arith.select %45, %46, %47 : vector<1x128xi1>, vector<1x128xf32>
    %c1_i32 = arith.constant 1 : i32
    %49 = vector.broadcast %c1_i32 : i32 to vector<1x128xi32>
    %50 = arith.cmpi eq, %43, %49 : vector<1x128xi32>
    %cst_15 = arith.constant 0.000000e+00 : f32
    %51 = vector.broadcast %42 : f32 to vector<1x128xf32>
    %52 = vector.broadcast %cst_15 : f32 to vector<1x128xf32>
    %53 = arith.select %50, %51, %52 : vector<1x128xi1>, vector<1x128xf32>
    %54 = arith.addf %48, %53 : vector<1x128xf32>
    %55 = vector.shape_cast %54 : vector<1x128xf32> to vector<1x1x128xf32>
    %c0_16 = arith.constant 0 : index
    %c0_17 = arith.constant 0 : index
    %c0_18 = arith.constant 0 : index
    %c0_19 = arith.constant 0 : index
    %56 = vector.load %arg5[%c0_16, %c0_17, %c0_18, %c0_19] : memref<1x1x1x128xf32, #tpu.memory_space<vmem>>, vector<1x1x1x128xf32>
    %57 = vector.shape_cast %56 : vector<1x1x1x128xf32> to vector<1x1x128xf32>
    %58 = vector.shape_cast %55 : vector<1x1x128xf32> to vector<1x1x1x128xf32>
    tpu.vector_store %arg5[%c0_16, %c0_17, %c0_18, %c0_19], %58 {strides = array<i32>} : memref<1x1x1x128xf32, #tpu.memory_space<vmem>>, vector<1x1x1x128xf32>,
    return
  }
  func.func @transform_0(%arg0: i32, %arg1: i32) -> (i32, i32) {
    %c0_i32 = arith.constant 0 : i32
    %c0_i32_0 = arith.constant 0 : i32
    %c0_i32_1 = arith.constant 0 : i32
    return %c0_i32, %c0_i32_0 : i32, i32
  }
  func.func @transform_1(%arg0: i32, %arg1: i32) -> (i32, i32, i32) {
    %c0_i32 = arith.constant 0 : i32
    %c0_i32_0 = arith.constant 0 : i32
    return %arg0, %c0_i32, %arg1 : i32, i32, i32
  }
  func.func @transform_2(%arg0: i32, %arg1: i32) -> (i32, i32, i32) {
    %c0_i32 = arith.constant 0 : i32
    %c0_i32_0 = arith.constant 0 : i32
    return %arg0, %c0_i32, %arg1 : i32, i32, i32
  }
  func.func @transform_3(%arg0: i32, %arg1: i32) -> (i32, i32, i32, i32) {
    %c0_i32 = arith.constant 0 : i32
    %c0_i32_0 = arith.constant 0 : i32
    %c0_i32_1 = arith.constant 0 : i32
    return %arg0, %arg1, %c0_i32, %c0_i32_0 : i32, i32, i32, i32
  }
}

</mosaic_0001>

<bundles_post_ra>
// kernel: sss_loss.1
= control target key start
LH: loop header
LB: loop body
LE: loop exit
PB: predicated region body
PF: predicated region fallthrough
CT: control target
= control target key end

     0   :  { %s1016_s12 = smov 0   ;;  %s1018_s13 = smov 0   ;;  %s1211_s0 = inlined_call_operand.vmem [shape: bf16[80,64], index: 0, kind: input, shape index: {}]   ;;  %s1212_s1 = inlined_call_operand.vmem [shape: bf16[2,64,128], index: 1, kind: input, shape index: {}]   ;;  %s1213_s2 = inlined_call_operand.vmem [shape: bf16[2,64,128], index: 2, kind: input, shape index: {}]   ;;  %s1214_s3 = inlined_call_operand.vmem [shape: f32[2,1,1,128], index: 3, kind: output, shape index: {}]  }
   0x1   :  { %s1020_s14 = smov 0  }
   0x2 LB: > { %s25_s15 = sadd.s32 1, %s988_s13  ;;  %p781_p0 = scmp.ge.s32.totalorder %s992_s14, 1  ;;  %s992_s14 = sphi %s1020_s14, %s13_s14   ;;  %s988_s13 = sphi %s1018_s13, %s1216_s13   ;;  %s984_s12 = sphi %s1016_s12, %s1215_s12  }
   0x3   : > { %p27_p1 = scmp.ge.s32.totalorder %s25_s15, 2  ;;  %p171_p2 = scmp.lt.s32.totalorder %s992_s14, 3 }
   0x5   : > { %s1218_s15 = smov (%p27_p1, %s25_s15), 0  ;;  %p172_p3 = pnand %p781_p0, %p171_p2 }
   0x6   : > { %p207_p4 = scmp.lt.s32.totalorder (!%p172_p3), %s984_s12, 1  ;;  %v994_v0 = vmov (!%p172_p3), 0.0   ;;  %vm995_vm0 = vmmov (!%p172_p3), 0   ;;  %v925_v9 = vld [vmem:[%s1211_s0] sm:$0xff] (!%p172_p3)   ;;  %vm297_vm1 = vcmask (!%p172_p3), 523264   ;;  %v926_v10 = vld [vmem:[%s1211_s0 + $0x8] sm:$0xff] (!%p172_p3)  }
   0x7   : > { %175 = sbr.rel (%p172_p3) target bundleno = 532 (0x214), region = 32  ;;  %831 = vmatprep.subr.bf16.mxu0 (!%p172_p3), %v994_v0  ;;  %859 = vmatprep.subr.bf16.mxu1 (!%p172_p3), %v994_v0  ;;  %v927_v11 = vld [vmem:[%s1211_s0 + $0x10] sm:$0xff] (!%p172_p3)   ;;  %v928_v12 = vld [vmem:[%s1211_s0 + $0x18] sm:$0xff] (!%p172_p3)   ;;  %v929_v13 = vld [vmem:[%s1211_s0 + $0x20] sm:$0xff] (!%p172_p3)  }
   0x8   : > { %839 = vmatprep.mubr.msk.bf16.mxu0 (!%p172_p3), %vm995_vm0, %v994_v0  ;;  %867 = vmatprep.mubr.msk.bf16.mxu1 (!%p172_p3), %vm995_vm0, %v994_v0 }
   0xe   : > { %s1220_s12 = smov (!%p207_p4, %s984_s12), 1 }
   0xf   : > { %s811_s16 = sshll.u32 %s1220_s12, 5  ;;  %s228_s10 = scalar_lea.vmem %s1214_s3, %s1220_s12 }
  0x10   : > { %s214_s19 = scalar_lea.vmem %s1212_s1, %s811_s16  ;;  %s222_s22 = scalar_lea.vmem %s1213_s2, %s811_s16 }
  0x11   : > { %v917_v1 = vld [vmem:[%s214_s19] sm:$0xff]   ;;  %v919_v3 = vld [vmem:[%s214_s19 + $0x8] sm:$0xff]   ;;  %v921_v5 = vld [vmem:[%s214_s19 + $0x10] sm:$0xff]  }
  0x12   : > { %v918_v2 = vld [vmem:[%s222_s22] sm:$0xff]   ;;  %832 = vmatpush3.bf16.msra.mxu0 %v917_v1  ;;  %v920_v4 = vld [vmem:[%s222_s22 + $0x8] sm:$0xff]   ;;  %v922_v6 = vld [vmem:[%s222_s22 + $0x10] sm:$0xff]  }
  0x13   : > { %860 = vmatpush3.bf16.msra.mxu1 %v918_v2  ;;  %833 = vmatprep.subr.bf16.mxu0 %v994_v0  ;;  %v923_v7 = vld [vmem:[%s214_s19 + $0x18] sm:$0xff]  }
  0x14   : > { %861 = vmatprep.subr.bf16.mxu1 %v994_v0  ;;  %v924_v8 = vld [vmem:[%s222_s22 + $0x18] sm:$0xff]  }
  0x16   : > { %834 = vmatpush3.bf16.msra.mxu0 %v919_v3 }
  0x17   : > { %862 = vmatpush3.bf16.msra.mxu1 %v920_v4  ;;  %835 = vmatprep.subr.bf16.mxu0 %v994_v0 }
  0x18   : > { %863 = vmatprep.subr.bf16.mxu1 %v994_v0 }
  0x1a   : > { %836 = vmatpush3.bf16.msra.mxu0 %v921_v5 }
  0x1b   : > { %864 = vmatpush3.bf16.msra.mxu1 %v922_v6  ;;  %837 = vmatprep.subr.bf16.mxu0 %v994_v0 }
  0x1c   : > { %865 = vmatprep.subr.bf16.mxu1 %v994_v0 }
  0x1e   : > { %838 = vmatpush3.bf16.msra.mxu0 %v923_v7 }
  0x1f   : > { %866 = vmatpush3.bf16.msra.mxu1 %v924_v8 }
  0x21   : > { %840 = vmatmul.mubr.msk.bf16.vlgmr.msra.gmra.mrb[0].mxu0 %vm297_vm1, %v925_v9 }
  0x22   : > { %868 = vmatmul.mubr.msk.bf16.vlgmr.msra.gmra.mrb[0].mxu1 %vm297_vm1, %v925_v9  ;;  %843 = vmatprep.mubr.msk.bf16.mxu0 %vm995_vm0, %v994_v0 }
  0x23   : > { %871 = vmatprep.mubr.msk.bf16.mxu1 %vm995_vm0, %v994_v0 }
  0x29   : > { %844 = vmatmul.mubr.msk.bf16.gmra.mrb[4].mxu0 %vm297_vm1, %v926_v10 }
  0x2a   : > { %872 = vmatmul.mubr.msk.bf16.gmra.mrb[4].mxu1 %vm297_vm1, %v926_v10  ;;  %847 = vmatprep.mubr.msk.bf16.mxu0 %vm995_vm0, %v994_v0 }
  0x2b   : > { %875 = vmatprep.mubr.msk.bf16.mxu1 %vm995_vm0, %v994_v0 }
  0x31   : > { %848 = vmatmul.mubr.msk.bf16.gmra.mrb[8].mxu0 %vm297_vm1, %v927_v11 }
  0x32   : > { %876 = vmatmul.mubr.msk.bf16.gmra.mrb[8].mxu1 %vm297_vm1, %v927_v11  ;;  %851 = vmatprep.mubr.msk.bf16.mxu0 %vm995_vm0, %v994_v0 }
  0x33   : > { %879 = vmatprep.mubr.msk.bf16.mxu1 %vm995_vm0, %v994_v0 }
  0x39   : > { %852 = vmatmul.mubr.msk.bf16.gmra.mrb[12].mxu0 %vm297_vm1, %v928_v12 }
  0x3a   : > { %880 = vmatmul.mubr.msk.bf16.gmra.mrb[12].mxu1 %vm297_vm1, %v928_v12  ;;  %855 = vmatprep.mubr.msk.bf16.mxu0 %vm995_vm0, %v994_v0 }
  0x3b   : > { %883 = vmatprep.mubr.msk.bf16.mxu1 %vm995_vm0, %v994_v0 }
  0x41   : > { %856 = vmatmul.mubr.msk.bf16.gmra.mrb[16].mxu0 %vm297_vm1, %v929_v13 }
  0x42   : > { %884 = vmatmul.mubr.msk.bf16.gmra.mrb[16].mxu1 %vm297_vm1, %v929_v13 }
  0xf4   : > { %v347_v14 = vpop.f32.mrb[0].mxu0 }
  0xf5   : > { %v452_v15 = vpop.f32.mrb[0].mxu1  ;;  %v841_v16 = vpop.f32.mrb[1].mxu0  ;;  %v491_v35 = vmul.f32 %v347_v14, %v347_v14 }
  0xf6   : > { %v869_v17 = vpop.f32.mrb[1].mxu1  ;;  %v350_v18 = vpop.f32.mrb[2].mxu0  ;;  %v541_v39 = vmul.f32 %v452_v15, %v452_v15 }
  0xf7   : > { %v455_v19 = vpop.f32.mrb[2].mxu1  ;;  %v842_v20 = vpop.f32.mrb[3].mxu0  ;;  %v492_v45 = vmul.f32 %v350_v18, %v350_v18 }
  0xf8   : > { %v870_v21 = vpop.f32.mrb[3].mxu1  ;;  %v542_v49 = vmul.f32 %v455_v19, %v455_v19 }
  0xfc   : > { %v355_v22 = vpop.f32.mrb[4].mxu0 }
  0xfd   : > { %v460_v23 = vpop.f32.mrb[4].mxu1  ;;  %v845_v24 = vpop.f32.mrb[5].mxu0  ;;  %v493_v53 = vmul.f32 %v355_v22, %v355_v22 }
  0xfe   : > { %v873_v25 = vpop.f32.mrb[5].mxu1  ;;  %v358_v26 = vpop.f32.mrb[6].mxu0  ;;  %v543_v58 = vmul.f32 %v460_v23, %v460_v23 }
  0xff   : > { %v463_v27 = vpop.f32.mrb[6].mxu1  ;;  %v846_v28 = vpop.f32.mrb[7].mxu0  ;;  %v494_v63 = vmul.f32 %v358_v26, %v358_v26 }
 0x100   : > { %v874_v29 = vpop.f32.mrb[7].mxu1  ;;  %v544_v0 = vmul.f32 %v463_v27, %v463_v27 }
 0x104   : > { %v363_v30 = vpop.f32.mrb[8].mxu0 }
 0x105   : > { %v468_v31 = vpop.f32.mrb[8].mxu1  ;;  %v849_v32 = vpop.f32.mrb[9].mxu0  ;;  %v495_v2 = vmul.f32 %v363_v30, %v363_v30 }
 0x106   : > { %v877_v33 = vpop.f32.mrb[9].mxu1  ;;  %v366_v34 = vpop.f32.mrb[10].mxu0  ;;  %v545_v3 = vmul.f32 %v468_v31, %v468_v31 }
 0x107   : > { %v496_v36 = vmul.f32 %v366_v34, %v366_v34  ;;  %v471_v37 = vpop.f32.mrb[10].mxu1  ;;  %v850_v38 = vpop.f32.mrb[11].mxu0 }
 0x108   : > { %v546_v40 = vmul.f32 %v471_v37, %v471_v37  ;;  %v878_v41 = vpop.f32.mrb[11].mxu1 }
 0x109   : > { %v1078_v42 = vadd.f32 %v496_v36, %v491_v35 }
 0x10a   : > { %v1080_v43 = vadd.f32 %v546_v40, %v541_v39 }
 0x10b   : > { %930 = vrsqrt.f32 %v1078_v42  ;;  %vm508_vm2 = vcmp.eq.f32.partialorder %v1078_v42, inf  ;;  %vm510_vm3 = vcmp.eq.f32.partialorder %v1078_v42, 0.0  ;;  %v511_v5 = vand.u32 2147483648, %v1078_v42 }
 0x10c   : > { %932 = vrsqrt.f32 %v1080_v43  ;;  %v371_v44 = vpop.f32.mrb[12].mxu0  ;;  %vm558_vm4 = vcmp.eq.f32.partialorder %v1080_v43, inf  ;;  %vm560_vm6 = vcmp.eq.f32.partialorder %v1080_v43, 0.0  ;;  %v561_v10 = vand.u32 2147483648, %v1080_v43 }
 0x10d   : > { %v497_v46 = vmul.f32 %v371_v44, %v371_v44  ;;  %v476_v47 = vpop.f32.mrb[12].mxu1  ;;  %v853_v48 = vpop.f32.mrb[13].mxu0 }
 0x10e   : > { %v547_v50 = vmul.f32 %v476_v47, %v476_v47  ;;  %v881_v51 = vpop.f32.mrb[13].mxu1  ;;  %v374_v52 = vpop.f32.mrb[14].mxu0 }
 0x10f   : > { %v1084_v54 = vadd.f32 %v497_v46, %v492_v45  ;;  %v498_v55 = vmul.f32 %v374_v52, %v374_v52  ;;  %v479_v56 = vpop.f32.mrb[14].mxu1  ;;  %v854_v57 = vpop.f32.mrb[15].mxu0 }
 0x110   : > { %v1086_v59 = vadd.f32 %v547_v50, %v542_v49  ;;  %v548_v60 = vmul.f32 %v479_v56, %v479_v56  ;;  %v882_v61 = vpop.f32.mrb[15].mxu1 }
 0x111   : > { %934 = vrsqrt.f32 %v1084_v54  ;;  %v1089_v62 = vadd.f32 %v498_v55, %v493_v53  ;;  %vm515_vm5 = vcmp.eq.f32.partialorder %v1084_v54, inf  ;;  %vm517_vm7 = vcmp.eq.f32.partialorder %v1084_v54, 0.0 }
 0x112   : > { %936 = vrsqrt.f32 %v1086_v59  ;;  %v1092_v1 = vadd.f32 %v548_v60, %v543_v58  ;;  %v518_v16 = vand.u32 2147483648, %v1084_v54  ;;  %vm565_vm9 = vcmp.eq.f32.partialorder %v1086_v59, inf }
 0x113   : > { %938 = vrsqrt.f32 %v1089_v62  ;;  %vm522_vm8 = vcmp.eq.f32.partialorder %v1089_v62, inf  ;;  %vm524_vm10 = vcmp.eq.f32.partialorder %v1089_v62, 0.0  ;;  %v525_v27 = vand.u32 2147483648, %v1089_v62 }
 0x114   : > { %940 = vrsqrt.f32 %v1092_v1  ;;  %v379_v4 = vpop.f32.mrb[16].mxu0  ;;  %vm567_vm11 = vcmp.eq.f32.partialorder %v1086_v59, 0.0  ;;  %v568_v29 = vand.u32 2147483648, %v1086_v59  ;;  %vm572_vm12 = vcmp.eq.f32.partialorder %v1092_v1, inf }
 0x115   : > { %v931_v6 = vpop.eup %930  ;;  %v499_v7 = vmul.f32 %v379_v4, %v379_v4  ;;  %v484_v8 = vpop.f32.mrb[16].mxu1  ;;  %vm574_vm13 = vcmp.eq.f32.partialorder %v1092_v1, 0.0  ;;  %v575_v31 = vand.u32 2147483648, %v1092_v1 }
 0x116   : > { %v857_v9 = vpop.f32.mrb[17].mxu0  ;;  %v933_v11 = vpop.eup %932  ;;  %v549_v12 = vmul.f32 %v484_v8, %v484_v8  ;;  %v507_v15 = vmul.f32 %v931_v6, %v1078_v42 }
 0x117   : > { %v885_v13 = vpop.f32.mrb[17].mxu1  ;;  %v382_v14 = vpop.f32.mrb[18].mxu0  ;;  %v1106_v17 = vadd.f32 %v499_v7, %v494_v63  ;;  %v557_v24 = vmul.f32 %v933_v11, %v1080_v43 }
 0x118   : > { %v500_v18 = vmul.f32 %v382_v14, %v382_v14  ;;  %v487_v19 = vpop.f32.mrb[18].mxu1  ;;  %v858_v20 = vpop.f32.mrb[19].mxu0  ;;  %v1110_v21 = vadd.f32 %v549_v12, %v544_v0  ;;  %v509_v26 = vsel %vm508_vm2, %v1078_v42, %v507_v15 }
 0x119   : > { %v550_v22 = vmul.f32 %v487_v19, %v487_v19  ;;  %v886_v23 = vpop.f32.mrb[19].mxu1  ;;  %942 = vrsqrt.f32 %v1106_v17  ;;  %v512_v33 = vsel %vm510_vm3, %v511_v5, %v509_v26  ;;  %v559_v35 = vsel %vm558_vm4, %v1080_v43, %v557_v24 }
 0x11a   : > { %v1115_v25 = vadd.f32 %v500_v18, %v495_v2  ;;  %944 = vrsqrt.f32 %v1110_v21  ;;  %vm529_vm14 = vcmp.eq.f32.partialorder %v1106_v17, inf  ;;  %v532_v37 = vand.u32 2147483648, %v1106_v17 }
 0x11b   : > { %v1122_v28 = vadd.f32 %v550_v22, %v545_v3  ;;  %v935_v30 = vpop.eup %934  ;;  %v562_v38 = vsel %vm560_vm6, %v561_v10, %v559_v35  ;;  %vm531_vm15 = vcmp.eq.f32.partialorder %v1106_v17, 0.0  ;;  %vm579_vm0 = vcmp.eq.f32.partialorder %v1110_v21, inf }
 0x11c   : > { %946 = vrsqrt.f32 %v1115_v25  ;;  %v937_v32 = vpop.eup %936  ;;  %v514_v34 = vmul.f32 %v935_v30, %v1084_v54  ;;  %v539_v44 = vand.u32 2147483648, %v1115_v25  ;;  %vm536_vm1 = vcmp.eq.f32.partialorder %v1115_v25, inf }
 0x11d   : > { %948 = vrsqrt.f32 %v1122_v28  ;;  %v939_v36 = vpop.eup %938  ;;  %v564_v39 = vmul.f32 %v937_v32, %v1086_v59  ;;  %vm581_vm2 = vcmp.eq.f32.partialorder %v1110_v21, 0.0  ;;  %v582_v47 = vand.u32 2147483648, %v1110_v21 }
 0x11e   : > { %v941_v40 = vpop.eup %940  ;;  %v516_v41 = vsel %vm515_vm5, %v1084_v54, %v514_v34  ;;  %v521_v42 = vmul.f32 %v939_v36, %v1089_v62  ;;  %vm538_vm3 = vcmp.eq.f32.partialorder %v1115_v25, 0.0  ;;  %vm586_vm4 = vcmp.eq.f32.partialorder %v1122_v28, inf }
 0x11f   : > { %v519_v45 = vsel %vm517_vm7, %v518_v16, %v516_v41  ;;  %v566_v43 = vsel %vm565_vm9, %v1086_v59, %v564_v39  ;;  %v571_v46 = vmul.f32 %v941_v40, %v1092_v1  ;;  %v591_v50 = vsub.f32 %v512_v33, %v562_v38 }
 0x120   : > { %v523_v48 = vsel %vm522_vm8, %v1089_v62, %v521_v42  ;;  %v569_v49 = vsel %vm567_vm11, %v568_v29, %v566_v43  ;;  %v614_v51 = vadd.f32 1e-08, %v562_v38  ;;  %vm588_vm5 = vcmp.eq.f32.partialorder %v1122_v28, 0.0 }
 0x121   : > { %v526_v52 = vsel %vm524_vm10, %v525_v27, %v523_v48  ;;  %v573_v53 = vsel %vm572_vm12, %v1092_v1, %v571_v46  ;;  %v592_v54 = vsub.f32 %v519_v45, %v569_v49  ;;  %v615_v55 = vadd.f32 1e-08, %v569_v49 }
 0x122   : > { %v576_v56 = vsel %vm574_vm13, %v575_v31, %v573_v53  ;;  %v596_v57 = vand.u32 2147483647, %v591_v50  ;;  %950 = vlog2.f32 %v614_v51  ;;  %v635_v58 = vadd.f32 1e-08, %v512_v33 }
 0x123   : > { %v943_v59 = vpop.eup %942  ;;  %v593_v60 = vsub.f32 %v526_v52, %v576_v56  ;;  %v597_v61 = vand.u32 2147483647, %v592_v54  ;;  %v616_v63 = vadd.f32 1e-08, %v576_v56  ;;  %952 = vlog2.f32 %v615_v55 }
 0x124   : > { %v945_v62 = vpop.eup %944  ;;  %v528_v0 = vmul.f32 %v943_v59, %v1106_v17  ;;  %v636_v2 = vadd.f32 1e-08, %v519_v45  ;;  %v637_v3 = vadd.f32 1e-08, %v526_v52  ;;  %954 = vlog2.f32 %v635_v58 }
 0x125   : > { %v578_v5 = vmul.f32 %v945_v62, %v1110_v21  ;;  %v598_v6 = vand.u32 2147483647, %v593_v60  ;;  %v601_v1 = vadd.f32 %v597_v61, %v596_v57  ;;  %956 = vlog2.f32 %v616_v63 }
 0x126   : > { %v947_v4 = vpop.eup %946  ;;  %v530_v8 = vsel %vm529_vm14, %v1106_v17, %v528_v0  ;;  %v589_v10 = vand.u32 2147483648, %v1122_v28  ;;  %958 = vlog2.f32 %v636_v2 }
 0x127   : > { %v949_v7 = vpop.eup %948  ;;  %v535_v9 = vmul.f32 %v947_v4, %v1115_v25  ;;  %v533_v11 = vsel %vm531_vm15, %v532_v37, %v530_v8  ;;  %v580_v12 = vsel %vm579_vm0, %v1110_v21, %v578_v5  ;;  %v602_v14 = vadd.f32 %v601_v1, %v598_v6 }
 0x128   : > { %v585_v13 = vmul.f32 %v949_v7, %v1122_v28  ;;  %v583_v16 = vsel %vm581_vm2, %v582_v47, %v580_v12  ;;  %v638_v18 = vadd.f32 1e-08, %v533_v11  ;;  %960 = vlog2.f32 %v637_v3 }
 0x129   : > { %v537_v15 = vsel %vm536_vm1, %v1115_v25, %v535_v9  ;;  %v594_v20 = vsub.f32 %v533_v11, %v583_v16  ;;  %v617_v22 = vadd.f32 1e-08, %v583_v16 }
 0x12a   : > { %v540_v17 = vsel %vm538_vm3, %v539_v44, %v537_v15  ;;  %v587_v19 = vsel %vm586_vm4, %v1122_v28, %v585_v13  ;;  %962 = vlog2.f32 %v638_v18 }
 0x12b   : > { %v590_v23 = vsel %vm588_vm5, %v589_v10, %v587_v19  ;;  %v639_v24 = vadd.f32 1e-08, %v540_v17  ;;  %v599_v27 = vand.u32 2147483647, %v594_v20  ;;  %964 = vlog2.f32 %v617_v22 }
 0x12c   : > { %v595_v26 = vsub.f32 %v540_v17, %v590_v23  ;;  %v618_v21 = vadd.f32 1e-08, %v590_v23  ;;  %v951_v29 = vpop.eup %950 }
 0x12d   : > { %966 = vlog2.f32 %v639_v24  ;;  %v953_v30 = vpop.eup %952  ;;  %v603_v31 = vadd.f32 %v602_v14, %v599_v27  ;;  %v620_v32 = vmul.f32 0.6931472, %v951_v29 }
 0x12e   : > { %v600_v25 = vand.u32 2147483647, %v595_v26  ;;  %968 = vlog2.f32 %v618_v21  ;;  %v955_v33 = vpop.eup %954  ;;  %v622_v34 = vmul.f32 0.6931472, %v953_v30  ;;  %v678_v26 = vlaneseq }
 0x12f   : > { %v957_v35 = vpop.eup %956  ;;  %v630_v37 = vmul.f32 1.442695, %v620_v32  ;;  %v641_v28 = vmul.f32 0.6931472, %v955_v33 }
 0x130   : > { %v604_v36 = vadd.f32 %v603_v31, %v600_v25  ;;  %v959_v38 = vpop.eup %958  ;;  %v624_v39 = vmul.f32 0.6931472, %v957_v35  ;;  %v631_v40 = vmul.f32 1.442695, %v622_v34  ;;  %v679_v27 = vand.u32 127, %v678_v26 }
 0x131   : > { %v643_v41 = vmul.f32 0.6931472, %v959_v38  ;;  %v650_v42 = vmul.f32 1.442695, %v641_v28 }
 0x132   : > { %605 = vadd.xlane.f32.xlu0 %v604_v36  ;;  %v961_v44 = vpop.eup %960  ;;  %v632_v45 = vmul.f32 1.442695, %v624_v39  ;;  %vm680_vm6 = vcmp.eq.s32.totalorder %v679_v27, 0  ;;  %vm683_vm7 = vcmp.eq.s32.totalorder %v679_v27, 1 }
 0x133   : > { %v645_v43 = vmul.f32 0.6931472, %v961_v44  ;;  %v651_v46 = vmul.f32 1.442695, %v643_v41  ;;  %v655_v47 = vsub.f32 %v630_v37, %v650_v42 }
 0x134   : > { %v963_v48 = vpop.eup %962 }
 0x135   : > { %v965_v49 = vpop.eup %964  ;;  %v647_v50 = vmul.f32 0.6931472, %v963_v48  ;;  %v652_v51 = vmul.f32 1.442695, %v645_v43  ;;  %v656_v52 = vsub.f32 %v631_v40, %v651_v46  ;;  %v660_v55 = vand.u32 2147483647, %v655_v47 }
 0x136   : > { %v626_v54 = vmul.f32 0.6931472, %v965_v49 }
 0x137   : > { %v967_v53 = vpop.eup %966  ;;  %v653_v58 = vmul.f32 1.442695, %v647_v50  ;;  %v657_v59 = vsub.f32 %v632_v45, %v652_v51  ;;  %v661_v60 = vand.u32 2147483647, %v656_v52 }
 0x138   : > { %v969_v56 = vpop.eup %968  ;;  %v649_v57 = vmul.f32 0.6931472, %v967_v53  ;;  %v633_v63 = vmul.f32 1.442695, %v626_v54 }
 0x139   : > { %v628_v61 = vmul.f32 0.6931472, %v969_v56  ;;  %v662_v0 = vand.u32 2147483647, %v657_v59  ;;  %v665_v2 = vadd.f32 %v661_v60, %v660_v55 }
 0x13a   : > { %v654_v62 = vmul.f32 1.442695, %v649_v57  ;;  %v658_v4 = vsub.f32 %v633_v63, %v653_v58 }
 0x13b   : > { %v634_v3 = vmul.f32 1.442695, %v628_v61  ;;  %v666_v5 = vadd.f32 %v665_v2, %v662_v0 }
 0x13c   : > { %v663_v1 = vand.u32 2147483647, %v658_v4 }
 0x13d   : > { %v659_v6 = vsub.f32 %v634_v3, %v654_v62 }
 0x13e   : > { %v667_v8 = vadd.f32 %v666_v5, %v663_v1 }
 0x13f   : > { %v664_v7 = vand.u32 2147483647, %v659_v6 }
 0x141   : > { %v668_v9 = vadd.f32 %v667_v8, %v664_v7 }
 0x143   : > { %669 = vadd.xlane.f32.xlu0 %v668_v9 }
 0x1bf   : > { %v606_v10 = vpop.xlane.xlu0 %605 }
 0x1c0   : > { %v607_v11 = vrot.slane %v606_v10, 4 }
 0x1c2   : > { %v608_v12 = vadd.f32 %v607_v11, %v606_v10 }
 0x1c4   : > { %v609_v13 = vrot.slane %v608_v12, 2 }
 0x1c6   : > { %v610_v14 = vadd.f32 %v609_v13, %v608_v12 }
 0x1c8   : > { %v611_v15 = vrot.slane %v610_v14, 1 }
 0x1ca   : > { %v612_v16 = vadd.f32 %v611_v15, %v610_v14 }
 0x1cc   : > { %887 = vpush %v612_v16 }
 0x1d0   : > { %v670_v18 = vpop.xlane.xlu0 %669 }
 0x1d1   : > { %v671_v17 = vrot.slane %v670_v18, 4 }
 0x1d3   : > { %v672_v19 = vadd.f32 %v671_v17, %v670_v18 }
 0x1d5   : > { %v673_v20 = vrot.slane %v672_v19, 2 }
 0x1d7   : > { %v674_v22 = vadd.f32 %v673_v20, %v672_v19 }
 0x1d9   : > { %v675_v23 = vrot.slane %v674_v22, 1 }
 0x1db   : > { %v676_v24 = vadd.f32 %v675_v23, %v674_v22 }
 0x1dd   : > { %889 = vpush %v676_v24 }
 0x1fd   : > { %s888_s6 = spop %887 }
 0x1fe   : > { %v681_v21 = vstv %s888_s6 }
 0x1ff   : > { %v682_v30 = vsel %vm680_vm6, %v681_v21, 0.0 }
 0x20e   : > { %s890_s7 = spop %889 }
 0x20f   : > { %v684_v29 = vstv %s890_s7 }
 0x210   : > { %v685_v25 = vsel %vm683_vm7, %v684_v29, 0.0 }
 0x211   : > { %v686_v31 = vadd.f32 %v685_v25, %v682_v30 }
 0x213   : > { %687 = vst [vmem:[%s228_s10] sm:$0x1] %v686_v31 }
 0x214 PF: > { %s13_s14 = sadd.s32 1, %s992_s14   ;;  %s1215_s12 = smov %s988_s13 }
 0x215   : > { %p10_p5 = scmp.ge.s32.totalorder %s13_s14, 4   ;;  %s1216_s13 = smov %s1218_s15 }
 0x217   :  { %12 = sbr.rel (!%p10_p5) target bundleno = 2 (0x2), region = 65 }

</bundles_post_ra>
